<compile_context>
chip_gen: v7x
topology: tpu7x:2x2x1
jax: 0.10.0
libtpu: 0.0.40
codegen_flags: <defaults>
</compile_context>

<pallas_src>
import jax
import jax.numpy as jnp
from jax.experimental import pallas as pl
from jax.experimental.pallas import tpu as pltpu


def gcn_per_node_kernel(adj_ref, x_ref, w_ref, b_ref, o_ref, acc_ref):
    i = pl.program_id(0)          # row-block of adj (reduction for the output)
    k = pl.program_id(1)          # col-block of adj (reduction for the output)

    @pl.when(jnp.logical_and(i == 0, k == 0))
    def _init():
        acc_ref[...] = jnp.zeros_like(acc_ref)

    # s_blk = adj[i_blk, k_blk] @ x[k_blk]  : (BN, F)   -- MXU, f32 accumulate
    s_blk = jnp.dot(adj_ref[...], x_ref[...], preferred_element_type=jnp.float32)
    # acc  += W[:, i_blk] @ s_blk           : (O, F)    -- MXU, no transposes
    acc_ref[...] += jnp.dot(w_ref[...], s_blk, preferred_element_type=jnp.float32)

    @pl.when(jnp.logical_and(i == pl.num_programs(0) - 1,
                             k == pl.num_programs(1) - 1))
    def _finalize():
        # bias added exactly once, in the epilogue (not per reduction step)
        o_ref[...] = (acc_ref[...] + b_ref[...]).astype(o_ref.dtype)


def _pick_tile(n):
    """Largest 128-aligned tile that divides n; fall back to whole extent."""
    for t in (512, 256, 128):
        if n >= t and n % t == 0:
            return t
    return n


def gcn_per_node(adj, layer_input, weight, bias, *, compute_dtype=None):
    """adj: (N,N) dense f32, layer_input: (N,F), weight: (O,N), bias: (O,).

    Returns (F, O), matching torch: lin((adj @ layer_input).T).
    compute_dtype=jnp.bfloat16 halves adj HBM traffic (adj values are exact in
    bf16); accumulation is always f32.
    """
    N, F = layer_input.shape
    O = weight.shape[0]
    assert adj.shape == (N, N) and weight.shape == (O, N) and bias.shape == (O,)

    if compute_dtype is not None:
        adj = adj.astype(compute_dtype)
        layer_input = layer_input.astype(compute_dtype)
        weight = weight.astype(compute_dtype)

    BN = _pick_tile(N)
    BK = _pick_tile(N)
    grid = (N // BN, N // BK)

    bias2d = bias.reshape(O, 1).astype(jnp.float32)   # broadcast over F lanes

    itemsize = jnp.dtype(adj.dtype).itemsize
    cost = pl.CostEstimate(
        flops=2 * N * N * F + 2 * N * F * O,
        transcendentals=0,
        bytes_accessed=(N * N + N * F + O * N) * itemsize + (F * O + O) * 4,
    )

    out_T = pl.pallas_call(
        gcn_per_node_kernel,
        out_shape=jax.ShapeDtypeStruct((O, F), jnp.float32),
        grid_spec=pltpu.PrefetchScalarGridSpec(
            num_scalar_prefetch=0,
            grid=grid,
            in_specs=[
                pl.BlockSpec((BN, BK), lambda i, k: (i, k)),   # adj tile
                pl.BlockSpec((BK, F), lambda i, k: (k, 0)),    # x tile
                pl.BlockSpec((O, BN), lambda i, k: (0, i)),    # W tile
                pl.BlockSpec((O, 1), lambda i, k: (0, 0)),     # bias (epilogue)
            ],
            out_specs=pl.BlockSpec((O, F), lambda i, k: (0, 0)),  # resident
            scratch_shapes=[pltpu.VMEM((O, F), jnp.float32)],     # accumulator
        ),
        compiler_params=pltpu.CompilerParams(
            # Output is accumulated across BOTH grid axes -> both arbitrary.
            dimension_semantics=("arbitrary", "arbitrary"),
            # Under v7x's 64 MiB physical VMEM, above v5e/v6e scoped defaults.
            vmem_limit_bytes=48 * 1024 * 1024,
        ),
        cost_estimate=cost,
    )(adj, layer_input, weight, bias2d)

    # Kernel emits (O, F); module contract is (F, O).
    return out_T.T


if __name__ == "__main__":
    # Small shapes consistent with the module:
    #   N nodes = in_features of the Linear, F feature dim, O out_features.
    N, F, O = 16, 8, 32

    key = jax.random.PRNGKey(0)
    k_adj, k_x, k_w, k_b = jax.random.split(key, 4)

    # Dense "adjacency" (what sparse.mm would multiply by), float32.
    adj = (jax.random.uniform(k_adj, (N, N)) > 0.7).astype(jnp.float32)
    adj = adj + jnp.eye(N, dtype=jnp.float32)          # add self loops
    layer_input = jax.random.normal(k_x, (N, F), dtype=jnp.float32)

    # nn.Linear(in_features=N, out_features=O) deterministic init:
    # U(-1/sqrt(N), 1/sqrt(N)) for both weight and bias.
    bound = 1.0 / (N ** 0.5)
    weight = jax.random.uniform(k_w, (O, N), minval=-bound, maxval=bound,
                                dtype=jnp.float32)
    bias = jax.random.uniform(k_b, (O,), minval=-bound, maxval=bound,
                              dtype=jnp.float32)

    # Pure-JAX reference (same math as the PyTorch forward).
    ref = (adj @ layer_input).T @ weight.T + bias

    # f32 path (exact semantics of the module).
    out = gcn_per_node(adj, layer_input, weight, bias)
    out = jax.block_until_ready(out)
    assert out.shape == (F, O)
    assert jnp.allclose(out, ref, rtol=1e-4, atol=1e-4)

    # bf16 fast path (halves adj HBM traffic; adj values exact in bf16).
    out_bf16 = gcn_per_node(adj, layer_input, weight, bias,
                            compute_dtype=jnp.bfloat16)
    out_bf16 = jax.block_until_ready(out_bf16)
    assert out_bf16.shape == (F, O)
    assert jnp.allclose(out_bf16, ref, rtol=1e-1, atol=1e-1)

    print("KERNEL_OK")
</pallas_src>

<mosaic_0001>
module attributes {stable_mosaic.version = 11 : i64} {
  func.func @gcn_per_node_kernel(%arg0: i32, %arg1: i32, %arg2: memref<16x16xf32, #tpu.memory_space<vmem>>, %arg3: memref<16x8xf32, #tpu.memory_space<vmem>>, %arg4: memref<32x16xf32, #tpu.memory_space<vmem>>, %arg5: memref<32x1xf32, #tpu.memory_space<vmem>>, %arg6: memref<32x8xf32, #tpu.memory_space<vmem>>, %arg7: memref<32x8xf32, #tpu.memory_space<vmem>>) attributes {dimension_semantics = [#tpu.dimension_semantics<arbitrary>, #tpu.dimension_semantics<arbitrary>], iteration_bounds = array<i64: 1, 1>, scalar_prefetch = 0 : i64, scratch_operands = 1 : i64, tpu.core_type = #tpu.core_type<tc>, window_params = [{transform_indices = @transform_0, window_bounds = array<i64: 16, 16>}, {transform_indices = @transform_1, window_bounds = array<i64: 16, 8>}, {transform_indices = @transform_2, window_bounds = array<i64: 32, 16>}, {pipeline_mode = #tpu.pipeline_mode<synchronous>, transform_indices = @transform_3, window_bounds = array<i64: 32, 1>}, {pipeline_mode = #tpu.pipeline_mode<synchronous>, transform_indices = @transform_4, window_bounds = array<i64: 32, 8>}]} {
    %c0_i32 = arith.constant 0 : i32
    %0 = arith.cmpi eq, %arg0, %c0_i32 : i32
    %c0_i32_0 = arith.constant 0 : i32
    %1 = arith.cmpi eq, %arg1, %c0_i32_0 : i32
    %2 = arith.andi %0, %1 : i1
    %3 = arith.extui %2 : i1 to i32
    %c0_i32_1 = arith.constant 0 : i32
    %4 = arith.cmpi ne, %3, %c0_i32_1 : i32
    scf.if %4 {
      %cst_15 = arith.constant 0.000000e+00 : f32
      %18 = vector.broadcast %cst_15 : f32 to vector<32x8xf32>
      %c0_16 = arith.constant 0 : index
      %c0_17 = arith.constant 0 : index
      %19 = vector.load %arg7[%c0_16, %c0_17] : memref<32x8xf32, #tpu.memory_space<vmem>>, vector<32x8xf32>
      tpu.vector_store %arg7[%c0_16, %c0_17], %18 {strides = array<i32>} : memref<32x8xf32, #tpu.memory_space<vmem>>, vector<32x8xf32>,
    } else {
    }
    %c0 = arith.constant 0 : index
    %c0_2 = arith.constant 0 : index
    %5 = vector.load %arg2[%c0, %c0_2] : memref<16x16xf32, #tpu.memory_space<vmem>>, vector<16x16xf32>
    %c0_3 = arith.constant 0 : index
    %c0_4 = arith.constant 0 : index
    %6 = vector.load %arg3[%c0_3, %c0_4] : memref<16x8xf32, #tpu.memory_space<vmem>>, vector<16x8xf32>
    %cst = arith.constant dense<0.000000e+00> : vector<16x8xf32>
    %7 = tpu.matmul %5, %6, %cst {dimension_numbers = #tpu.dot_dimension_numbers<[1], [0], [0], [1], [0, 0, 1, 1], [], []>} : vector<16x16xf32>, vector<16x8xf32>, vector<16x8xf32> -> vector<16x8xf32>
    %c0_5 = arith.constant 0 : index
    %c0_6 = arith.constant 0 : index
    %8 = vector.load %arg7[%c0_5, %c0_6] : memref<32x8xf32, #tpu.memory_space<vmem>>, vector<32x8xf32>
    %c0_7 = arith.constant 0 : index
    %c0_8 = arith.constant 0 : index
    %9 = vector.load %arg4[%c0_7, %c0_8] : memref<32x16xf32, #tpu.memory_space<vmem>>, vector<32x16xf32>
    %cst_9 = arith.constant dense<0.000000e+00> : vector<32x8xf32>
    %10 = tpu.matmul %9, %7, %cst_9 {dimension_numbers = #tpu.dot_dimension_numbers<[1], [0], [0], [1], [0, 0, 1, 1], [], []>} : vector<32x16xf32>, vector<16x8xf32>, vector<32x8xf32> -> vector<32x8xf32>
    %11 = arith.addf %8, %10 : vector<32x8xf32>
    %c0_10 = arith.constant 0 : index
    %c0_11 = arith.constant 0 : index
    %12 = vector.load %arg7[%c0_10, %c0_11] : memref<32x8xf32, #tpu.memory_space<vmem>>, vector<32x8xf32>
    tpu.vector_store %arg7[%c0_10, %c0_11], %11 {strides = array<i32>} : memref<32x8xf32, #tpu.memory_space<vmem>>, vector<32x8xf32>,
    %c0_i32_12 = arith.constant 0 : i32
    %13 = arith.cmpi eq, %arg0, %c0_i32_12 : i32
    %c0_i32_13 = arith.constant 0 : i32
    %14 = arith.cmpi eq, %arg1, %c0_i32_13 : i32
    %15 = arith.andi %13, %14 : i1
    %16 = arith.extui %15 : i1 to i32
    %c0_i32_14 = arith.constant 0 : i32
    %17 = arith.cmpi ne, %16, %c0_i32_14 : i32
    scf.if %17 {
      %c0_15 = arith.constant 0 : index
      %c0_16 = arith.constant 0 : index
      %18 = vector.load %arg7[%c0_15, %c0_16] : memref<32x8xf32, #tpu.memory_space<vmem>>, vector<32x8xf32>
      %c0_17 = arith.constant 0 : index
      %c0_18 = arith.constant 0 : index
      %19 = vector.load %arg5[%c0_17, %c0_18] : memref<32x1xf32, #tpu.memory_space<vmem>>, vector<32x1xf32>
      %20 = vector.broadcast %19 : vector<32x1xf32> to vector<32x8xf32>
      %21 = arith.addf %18, %20 : vector<32x8xf32>
      %c0_19 = arith.constant 0 : index
      %c0_20 = arith.constant 0 : index
      %22 = vector.load %arg6[%c0_19, %c0_20] : memref<32x8xf32, #tpu.memory_space<vmem>>, vector<32x8xf32>
      tpu.vector_store %arg6[%c0_19, %c0_20], %21 {strides = array<i32>} : memref<32x8xf32, #tpu.memory_space<vmem>>, vector<32x8xf32>,
    } else {
    }
    return
  }
  func.func @transform_0(%arg0: i32, %arg1: i32) -> (i32, i32) {
    %c0_i32 = arith.constant 0 : i32
    return %arg0, %arg1 : i32, i32
  }
  func.func @transform_1(%arg0: i32, %arg1: i32) -> (i32, i32) {
    %c0_i32 = arith.constant 0 : i32
    %c0_i32_0 = arith.constant 0 : i32
    return %arg1, %c0_i32 : i32, i32
  }
  func.func @transform_2(%arg0: i32, %arg1: i32) -> (i32, i32) {
    %c0_i32 = arith.constant 0 : i32
    %c0_i32_0 = arith.constant 0 : i32
    return %c0_i32, %arg0 : i32, i32
  }
  func.func @transform_3(%arg0: i32, %arg1: i32) -> (i32, i32) {
    %c0_i32 = arith.constant 0 : i32
    %c0_i32_0 = arith.constant 0 : i32
    %c0_i32_1 = arith.constant 0 : i32
    return %c0_i32, %c0_i32_0 : i32, i32
  }
  func.func @transform_4(%arg0: i32, %arg1: i32) -> (i32, i32) {
    %c0_i32 = arith.constant 0 : i32
    %c0_i32_0 = arith.constant 0 : i32
    %c0_i32_1 = arith.constant 0 : i32
    return %c0_i32, %c0_i32_0 : i32, i32
  }
}

</mosaic_0001>

<bundles_post_ra>
// kernel: tpu_custom_call.1
= control target key start
LH: loop header
LB: loop body
LE: loop exit
PB: predicated region body
PF: predicated region fallthrough
CT: control target
= control target key end

     0   :  { %vm32_vm0 = vcmask 130048   ;;  %vm23_vm1 = vcmask 64512   ;;  %v315_v6 = vmov 0   ;;  %v316_v9 = vmov 0.0   ;;  %s408_s1 = inlined_call_operand.vmem [shape: f32[16,8], index: 1, kind: input, shape index: {}]   ;;  %s409_s0 = inlined_call_operand.vmem [shape: f32[16,16], index: 0, kind: input, shape index: {}]   ;;  %s410_s2 = inlined_call_operand.vmem [shape: f32[32,16], index: 2, kind: input, shape index: {}]   ;;  %s411_s3 = inlined_call_operand.vmem [shape: f32[32,1], index: 3, kind: input, shape index: {}]   ;;  %s412_s4 = inlined_call_operand.vmem [shape: f32[32,8], index: 4, kind: output, shape index: {}]  }
   0x1   :  { %v30_v0 = vld [vmem:[%s408_s1] sm:$0xff]  ;;  %v31_v1 = vld [vmem:[%s408_s1 + $0x8] sm:$0xff]  ;;  %313 = vset.pattern.permute.xlu0 %v315_v6  ;;  %314 = vset.pattern.permute.xlu1 %v315_v6  ;;  %v236_v8 = vld [vmem:[%s411_s3 + $0x10] sm:$0xff]  ;;  %25 = vst.msk [vmem:[#allocation2 + $0x8] sm:$0xff] %vm23_vm1, %v316_v9 }
   0x2   :  { %v28_v2 = vld [vmem:[%s409_s0] sm:$0xff]  ;;  %v303_v3 = vpack.c.bf16 %v31_v1, %v30_v0  ;;  %v29_v4 = vld [vmem:[%s409_s0 + $0x8] sm:$0xff]  ;;  %24 = vst.msk [vmem:[#allocation2] sm:$0xff] %vm23_vm1, %v316_v9  ;;  %26 = vst.msk [vmem:[#allocation2 + $0x10] sm:$0xff] %vm23_vm1, %v316_v9  ;;  %250 = vperm.xlu1 %314, %v236_v8  }
   0x3   :  { %290 = vmatprep.mubr.msk.f32.mxu0 %vm32_vm0, %v28_v2  ;;  %v118_v5 = vld [vmem:[%s410_s2] sm:$0xff]  ;;  %27 = vst.msk [vmem:[#allocation2 + $0x18] sm:$0xff] %vm23_vm1, %v316_v9  ;;  %v235_v10 = vld [vmem:[%s411_s3 + $0x8] sm:$0xff]  ;;  %v237_v11 = vld [vmem:[%s411_s3 + $0x18] sm:$0xff] }
   0x4   :  { %304 = vmatprep.subr.bf16.mxu0 %v303_v3  ;;  %297 = vmatprep.mubr.msk.f32.mxu1 %vm32_vm0, %v118_v5  ;;  %v234_v7 = vld [vmem:[%s411_s3] sm:$0xff]  ;;  %v119_v15 = vld [vmem:[%s410_s2 + $0x8] sm:$0xff]  ;;  %v120_v16 = vld [vmem:[%s410_s2 + $0x10] sm:$0xff] }
   0x5   :  { %306 = vmatpush3.bf16.msra.mxu0 %v303_v3  ;;  %240 = vperm.xlu0 %313, %v234_v7   ;;  %v121_v17 = vld [vmem:[%s410_s2 + $0x18] sm:$0xff] }
   0x6   :  { %255 = vperm.xlu1 %314, %v237_v11  }
   0x8   :  { %291 = vmatmul.mubr.msk.f32.vlgmr.msra.gmra.mrb[0].mxu0 %vm32_vm0, %v29_v4  ;;  %v115_v18 = vld [vmem:[#allocation2 + $0x8] sm:$0xff] }
   0x9   :  { %245 = vperm.xlu0 %313, %v235_v10   ;;  %v114_v19 = vld [vmem:[#allocation2] sm:$0xff]  ;;  %v116_v26 = vld [vmem:[#allocation2 + $0x10] sm:$0xff] }
   0xa   :  { %v117_v24 = vld [vmem:[#allocation2 + $0x18] sm:$0xff] }
  0x81   :  { %v251_v31 = vpop.permute.xlu1 %250 }
  0x84   :  { %v241_v25 = vpop.permute.xlu0 %240 }
  0x85   :  { %v256_v37 = vpop.permute.xlu1 %255 }
  0x88   :  { %v246_v32 = vpop.permute.xlu0 %245 }
  0xdb   :  { %v292_v12 = vpop.f32.mrb[0].mxu0 }
  0xdc   :  { %v105_v13 = vpop.f32.mrb[1].mxu0 }
  0xdd   :  { %v307_v14 = vpack.c.bf16 %v292_v12, %v105_v13 }
  0xdf   :  { %308 = vmatprep.subr.bf16.mxu1 %v307_v14 }
  0xe0   :  { %310 = vmatpush3.bf16.msra.mxu1 %v307_v14 }
  0xe3   :  { %298 = vmatmul.mubr.msk.f32.vlgmr.msra.gmra.mrb[0].mxu1 %vm32_vm0, %v119_v15 }
  0xe4   :  { %300 = vmatprep.mubr.msk.f32.mxu1 %vm32_vm0, %v120_v16 }
  0xe7   :  { %301 = vmatmul.mubr.msk.f32.gmra.mrb[2].mxu1 %vm32_vm0, %v121_v17 }
 0x1b6   :  { %v299_v20 = vpop.f32.mrb[0].mxu1 }
 0x1b7   :  { %v220_v21 = vadd.f32 %v299_v20, %v115_v18  ;;  %v200_v22 = vpop.f32.mrb[1].mxu1 }
 0x1b8   :  { %v219_v23 = vadd.f32 %v200_v22, %v114_v19 }
 0x1b9   :  { %225 = vst.msk [vmem:[#allocation2 + $0x8] sm:$0xff] %vm23_vm1, %v220_v21 }
 0x1ba   :  { %224 = vst.msk [vmem:[#allocation2] sm:$0xff] %vm23_vm1, %v219_v23  ;;  %v302_v27 = vpop.f32.mrb[2].mxu1 }
 0x1bb   :  { %v222_v28 = vadd.f32 %v302_v27, %v117_v24  ;;  %v210_v29 = vpop.f32.mrb[3].mxu1 }
 0x1bc   :  { %v221_v30 = vadd.f32 %v210_v29, %v116_v26 }
 0x1bd   :  { %227 = vst.msk [vmem:[#allocation2 + $0x18] sm:$0xff] %vm23_vm1, %v222_v28 }
 0x1be   :  { %226 = vst.msk [vmem:[#allocation2 + $0x10] sm:$0xff] %vm23_vm1, %v221_v30 }
 0x1c0   :  { %v231_v33 = vld [vmem:[#allocation2 + $0x8] sm:$0xff] }
 0x1c1   :  { %v230_v34 = vld [vmem:[#allocation2] sm:$0xff]  ;;  %v259_v35 = vadd.f32 %v246_v32, %v231_v33 }
 0x1c2   :  { %v258_v36 = vadd.f32 %v241_v25, %v230_v34 }
 0x1c3   :  { %263 = vst.msk [vmem:[%s412_s4 + $0x8] sm:$0xff] %vm23_vm1, %v259_v35 }
 0x1c4   :  { %262 = vst.msk [vmem:[%s412_s4] sm:$0xff] %vm23_vm1, %v258_v36  ;;  %v233_v38 = vld [vmem:[#allocation2 + $0x18] sm:$0xff] }
 0x1c5   :  { %v232_v39 = vld [vmem:[#allocation2 + $0x10] sm:$0xff]  ;;  %v261_v40 = vadd.f32 %v256_v37, %v233_v38 }
 0x1c6   :  { %v260_v41 = vadd.f32 %v251_v31, %v232_v39 }
 0x1c7   :  { %265 = vst.msk [vmem:[%s412_s4 + $0x18] sm:$0xff] %vm23_vm1, %v261_v40 }
 0x1c8   :  { %264 = vst.msk [vmem:[%s412_s4 + $0x10] sm:$0xff] %vm23_vm1, %v260_v41 }

</bundles_post_ra>
